<compile_context>
chip_gen: v7x
topology: tpu7x:2x2x1
jax: 0.10.0
libtpu: 0.0.40
codegen_flags: <defaults>
</compile_context>

<pallas_src>
import functools
import math

import jax
import jax.numpy as jnp
from jax import lax
from jax.experimental import pallas as pl
from jax.experimental.pallas import tpu as pltpu


def _gelu_exact(x):
    # Matches torch.nn.GELU() default (erf-based, not tanh approximation).
    return 0.5 * x * (1.0 + lax.erf(x * (1.0 / math.sqrt(2.0))))


def _round_up(x, m):
    return ((x + m - 1) // m) * m


def _divisor_tiles(total, quantum):
    """Multiples of `quantum` dividing `total`, descending; fallback [total]."""
    tiles = [t for t in range(quantum, total + 1, quantum) if total % t == 0]
    tiles.sort(reverse=True)
    return tiles or [total]


def _device_kind():
    try:
        return jax.devices()[0].device_kind.lower()
    except Exception:
        return ""


def _physical_vmem_bytes():
    try:
        info = pltpu.get_tpu_info()
        for attr in ("vmem_capacity_bytes", "vmem_bytes", "vmem_size_bytes"):
            v = getattr(info, attr, None)
            if v:
                return int(v)
    except Exception:
        pass
    kind = _device_kind()
    if "v5" in kind or "v6" in kind:
        return 128 * 1024 * 1024
    return 64 * 1024 * 1024  # conservative (v7x per-TC VMEM / unknown)


def _choose_config(n, dim, hidden, glu, c_bytes, out_bytes,
                   tile_n=None, tile_h=None):
    """Pick (tile_n, tile_h, vmem_limit) sized for this TPU generation."""
    phys = _physical_vmem_bytes()
    budget = (phys * 3) // 4          # headroom for compiler-internal scratch
    kind = _device_kind()
    n_w1 = 2 if glu else 1

    def est(tn, th):
        nk = hidden // th
        b = 2 * tn * dim * c_bytes                 # x tile (+ double buffer)
        b += 2 * n_w1 * dim * th * c_bytes         # W1 slice(s)
        b += 2 * n_w1 * th * 4                     # b1 slice(s), f32
        b += 2 * th * dim * c_bytes                # W2 slice
        b += 2 * dim * 4                           # b2
        b += 2 * tn * dim * out_bytes              # out tile
        if nk > 1:
            b += tn * dim * 4                      # f32 accumulator scratch
        return b

    big_vmem = budget >= 80 * 1024 * 1024          # v5e / v6e (128 MiB physical)
    if tile_n is None:
        tile_n = (512 if "v5" in kind else 1024) if big_vmem else 512
    tile_n = max(8, min(_round_up(tile_n, 8), _round_up(n, 8)))
    if "v7" in kind and n >= 512:
        # keep >= 2 row tiles so the "parallel" axis shards across both v7x TCs
        tile_n = min(tile_n, _round_up((n + 1) // 2, 8))

    div = _divisor_tiles(hidden, 128)              # descending divisors of hidden
    if tile_h is not None:
        opts = [t for t in div if t <= tile_h]
        tile_h = opts[0] if opts else div[-1]
    elif est(tile_n, hidden) <= budget:
        tile_h = hidden                            # weight-resident fast path
    else:
        target_h = 1024 if big_vmem else 512
        opts = [t for t in div if t <= target_h]
        tile_h = opts[0] if opts else div[-1]

    # Shrink until the estimate fits (tile_h first, then tile_n).
    while est(tile_n, tile_h) > budget:
        smaller = [t for t in div if t < tile_h]
        if smaller:
            tile_h = smaller[0]
        elif tile_n > 8:
            tile_n = max(8, _round_up(tile_n // 2, 8))
        else:
            break
    return tile_n, tile_h, int(budget)


# ---------------------------------------------------------------------------
# Kernels.  Grid = (row tiles, hidden chunks); the hidden axis is a reduction
# for the second matmul.  num_k == 1 (weight-resident path) writes o_ref
# directly; otherwise an f32 VMEM scratch accumulates across k.
# ---------------------------------------------------------------------------
def _write_out(partial, b2_ref, o_ref, scratch, num_k):
    if num_k == 1:
        o_ref[...] = (partial + b2_ref[...]).astype(o_ref.dtype)
        return
    (acc_ref,) = scratch
    k = pl.program_id(1)

    @pl.when(k == 0)
    def _():
        acc_ref[...] = partial

    @pl.when(k != 0)
    def _():
        acc_ref[...] += partial

    @pl.when(k == num_k - 1)
    def _():
        o_ref[...] = (acc_ref[...] + b2_ref[...]).astype(o_ref.dtype)


def _ffn_kernel(x_ref, w1_ref, b1_ref, w2_ref, b2_ref, o_ref, *scratch,
                compute_dtype, num_k):
    h = jnp.dot(x_ref[...], w1_ref[...], preferred_element_type=jnp.float32)
    g = _gelu_exact(h + b1_ref[...])          # bias + GELU in f32
    # dropout(p=0.0) -> identity
    partial = jnp.dot(g.astype(compute_dtype), w2_ref[...],
                      preferred_element_type=jnp.float32)
    _write_out(partial, b2_ref, o_ref, scratch, num_k)


def _ffn_glu_kernel(x_ref, w1g_ref, b1g_ref, w1v_ref, b1v_ref, w2_ref, b2_ref,
                    o_ref, *scratch, compute_dtype, num_k):
    x = x_ref[...]
    a = jnp.dot(x, w1g_ref[...], preferred_element_type=jnp.float32) + b1g_ref[...]
    v = jnp.dot(x, w1v_ref[...], preferred_element_type=jnp.float32) + b1v_ref[...]
    g = _gelu_exact(a) * v
    # dropout(p=0.0) -> identity
    partial = jnp.dot(g.astype(compute_dtype), w2_ref[...],
                      preferred_element_type=jnp.float32)
    _write_out(partial, b2_ref, o_ref, scratch, num_k)


# ---------------------------------------------------------------------------
# Wrapper
# ---------------------------------------------------------------------------
def prepare_feed_forward_params(params, compute_dtype=jnp.bfloat16):
    """Cast weights to the MXU compute dtype ONCE (outside the per-call path)."""
    return {
        "w1": params["w1"].astype(compute_dtype),
        "b1": params["b1"].astype(jnp.float32),
        "w2": params["w2"].astype(compute_dtype),
        "b2": params["b2"].astype(jnp.float32),
    }


def feed_forward(x, params, *, glu=False, tile_n=None, tile_h=None,
                 compute_dtype=jnp.bfloat16):
    """x: [..., dim].  params: w1,b1,w2,b2 stored pre-transposed so the kernel
    does x @ W (PyTorch Linear: y = x @ W.T + b)."""
    w1, b1, w2, b2 = params["w1"], params["b1"], params["w2"], params["b2"]
    dim = x.shape[-1]
    hidden = w2.shape[0]                   # dim * mult

    # Only cast if the caller didn't pre-prepare the params (avoids a per-call
    # HBM read+write pass over the weights).
    if w1.dtype != compute_dtype:
        w1 = w1.astype(compute_dtype)
    if w2.dtype != compute_dtype:
        w2 = w2.astype(compute_dtype)
    if b1.dtype != jnp.float32:
        b1 = b1.astype(jnp.float32)
    if b2.dtype != jnp.float32:
        b2 = b2.astype(jnp.float32)

    out_dtype = x.dtype
    lead_shape = x.shape[:-1]
    n = 1
    for s in lead_shape:
        n *= int(s)
    # bf16 x in the wrapper: halves x HBM traffic / VMEM tile, removes per-k cast.
    x2d = x.reshape(n, dim).astype(compute_dtype)

    c_bytes = jnp.dtype(compute_dtype).itemsize
    out_bytes = jnp.dtype(out_dtype).itemsize
    tile_n, tile_h, vmem_budget = _choose_config(
        n, dim, hidden, glu, c_bytes, out_bytes, tile_n=tile_n, tile_h=tile_h)

    n_pad = _round_up(n, tile_n)
    if n_pad != n:  # ragged edge only; padded rows sliced off below
        x2d = jnp.pad(x2d, ((0, n_pad - n), (0, 0)))

    num_k = hidden // tile_h
    grid = (n_pad // tile_n, num_k)

    x_spec = pl.BlockSpec((tile_n, dim), lambda i, k: (i, 0))
    out_spec = pl.BlockSpec((tile_n, dim), lambda i, k: (i, 0))
    w2_spec = pl.BlockSpec((tile_h, dim), lambda i, k: (k, 0))
    b2_spec = pl.BlockSpec((1, dim), lambda i, k: (0, 0))
    scratch = [] if num_k == 1 else [pltpu.VMEM((tile_n, dim), jnp.float32)]

    common = dict(
        out_shape=jax.ShapeDtypeStruct((n_pad, dim), out_dtype),
        compiler_params=pltpu.CompilerParams(
            dimension_semantics=("parallel", "arbitrary"),
            vmem_limit_bytes=vmem_budget,
        ),
    )

    if not glu:
        out2d = pl.pallas_call(
            functools.partial(_ffn_kernel, compute_dtype=compute_dtype,
                              num_k=num_k),
            grid_spec=pltpu.PrefetchScalarGridSpec(
                num_scalar_prefetch=0,
                grid=grid,
                in_specs=[
                    x_spec,                                             # x rows
                    pl.BlockSpec((dim, tile_h), lambda i, k: (0, k)),   # W1 slice
                    pl.BlockSpec((1, tile_h), lambda i, k: (0, k)),     # b1 slice
                    w2_spec,                                            # W2 slice
                    b2_spec,                                            # b2
                ],
                out_specs=out_spec,
                scratch_shapes=scratch,
            ),
            **common,
        )(x2d, w1, b1, w2, b2)
    else:
        # Gate / value halves come from the SAME W1/b1 arrays; the value half
        # is addressed by offsetting the block index (no wrapper-side slices,
        # which would materialize extra HBM copies of W1 every call).
        out2d = pl.pallas_call(
            functools.partial(_ffn_glu_kernel, compute_dtype=compute_dtype,
                              num_k=num_k),
            grid_spec=pltpu.PrefetchScalarGridSpec(
                num_scalar_prefetch=0,
                grid=grid,
                in_specs=[
                    x_spec,
                    pl.BlockSpec((dim, tile_h), lambda i, k: (0, k)),          # W1 gate
                    pl.BlockSpec((1, tile_h), lambda i, k: (0, k)),            # b1 gate
                    pl.BlockSpec((dim, tile_h), lambda i, k: (0, k + num_k)),  # W1 value
                    pl.BlockSpec((1, tile_h), lambda i, k: (0, k + num_k)),    # b1 value
                    w2_spec,
                    b2_spec,
                ],
                out_specs=out_spec,
                scratch_shapes=scratch,
            ),
            **common,
        )(x2d, w1, b1, w1, b1, w2, b2)

    return out2d[:n].reshape(*lead_shape, dim)


def init_feed_forward_params(key, dim, mult=4, glu=False, dtype=jnp.float32):
    """Deterministic init mimicking nn.Linear shapes (stored pre-transposed)."""
    hidden = dim * mult
    w1_out = hidden * (2 if glu else 1)
    k1, k2, k3, k4 = jax.random.split(key, 4)
    lim1 = 1.0 / math.sqrt(dim)
    lim2 = 1.0 / math.sqrt(hidden)
    return {
        "w1": jax.random.uniform(k1, (dim, w1_out), dtype, -lim1, lim1),
        "b1": jax.random.uniform(k2, (1, w1_out), dtype, -lim1, lim1),
        "w2": jax.random.uniform(k3, (hidden, dim), dtype, -lim2, lim2),
        "b2": jax.random.uniform(k4, (1, dim), dtype, -lim2, lim2),
    }


def _reference(x, params, glu=False):
    h = x @ params["w1"] + params["b1"][0]
    if glu:
        hid = params["w2"].shape[0]
        a, v = h[..., :hid], h[..., hid:]
        g = _gelu_exact(a) * v
    else:
        g = _gelu_exact(h)
    return g @ params["w2"] + params["b2"][0]


if __name__ == "__main__":
    # Small shapes: batch=2, seq=8, dim=32, mult=4 -> hidden=128.
    key = jax.random.PRNGKey(0)
    k_x, k_p, k_pg = jax.random.split(key, 3)
    batch, seq, dim, mult = 2, 8, 32, 4
    x = jax.random.normal(k_x, (batch, seq, dim), jnp.float32)

    # --- Plain feed-forward path (glu=False) ---
    params = init_feed_forward_params(k_p, dim, mult=mult, glu=False)
    ref = _reference(x, params, glu=False)

    # f32 MXU path: tight check against the f32 reference.
    out_f32 = feed_forward(x, params, glu=False, compute_dtype=jnp.float32)
    jax.block_until_ready(out_f32)
    assert out_f32.shape == (batch, seq, dim)
    assert jnp.allclose(out_f32, ref, atol=1e-4, rtol=1e-4)

    # bf16 MXU path (default): prepared (pre-cast) weights, looser tolerance.
    params_bf16 = prepare_feed_forward_params(params)
    out_bf16 = feed_forward(x, params_bf16, glu=False)
    jax.block_until_ready(out_bf16)
    assert jnp.allclose(out_bf16, ref, atol=3e-2, rtol=3e-2)

    # --- GLU-gated path (glu=True) ---
    params_g = init_feed_forward_params(k_pg, dim, mult=mult, glu=True)
    ref_g = _reference(x, params_g, glu=True)

    out_g_f32 = feed_forward(x, params_g, glu=True, compute_dtype=jnp.float32)
    jax.block_until_ready(out_g_f32)
    assert jnp.allclose(out_g_f32, ref_g, atol=1e-4, rtol=1e-4)

    params_g_bf16 = prepare_feed_forward_params(params_g)
    out_g_bf16 = feed_forward(x, params_g_bf16, glu=True)
    jax.block_until_ready(out_g_bf16)
    assert jnp.allclose(out_g_bf16, ref_g, atol=3e-2, rtol=3e-2)

    print("KERNEL_OK")
</pallas_src>

<mosaic_0001>
module attributes {stable_mosaic.version = 11 : i64} {
  func.func @_ffn_kernel(%arg0: i32, %arg1: i32, %arg2: memref<16x32xf32, #tpu.memory_space<vmem>>, %arg3: memref<32x128xf32, #tpu.memory_space<vmem>>, %arg4: memref<1x128xf32, #tpu.memory_space<vmem>>, %arg5: memref<128x32xf32, #tpu.memory_space<vmem>>, %arg6: memref<1x32xf32, #tpu.memory_space<vmem>>, %arg7: memref<16x32xf32, #tpu.memory_space<vmem>>) attributes {dimension_semantics = [#tpu.dimension_semantics<parallel>, #tpu.dimension_semantics<arbitrary>], iteration_bounds = array<i64: 1, 1>, scalar_prefetch = 0 : i64, scratch_operands = 0 : i64, tpu.core_type = #tpu.core_type<tc>, window_params = [{transform_indices = @transform_0, window_bounds = array<i64: 16, 32>}, {transform_indices = @transform_1, window_bounds = array<i64: 32, 128>}, {transform_indices = @transform_2, window_bounds = array<i64: 1, 128>}, {transform_indices = @transform_3, window_bounds = array<i64: 128, 32>}, {pipeline_mode = #tpu.pipeline_mode<synchronous>, transform_indices = @transform_4, window_bounds = array<i64: 1, 32>}, {transform_indices = @transform_5, window_bounds = array<i64: 16, 32>}]} {
    %c0 = arith.constant 0 : index
    %c0_0 = arith.constant 0 : index
    %0 = vector.load %arg2[%c0, %c0_0] : memref<16x32xf32, #tpu.memory_space<vmem>>, vector<16x32xf32>
    %c0_1 = arith.constant 0 : index
    %c0_2 = arith.constant 0 : index
    %1 = vector.load %arg3[%c0_1, %c0_2] : memref<32x128xf32, #tpu.memory_space<vmem>>, vector<32x128xf32>
    %cst = arith.constant dense<0.000000e+00> : vector<16x128xf32>
    %2 = tpu.matmul %0, %1, %cst {dimension_numbers = #tpu.dot_dimension_numbers<[1], [0], [0], [1], [0, 0, 1, 1], [], []>} : vector<16x32xf32>, vector<32x128xf32>, vector<16x128xf32> -> vector<16x128xf32>
    %c0_3 = arith.constant 0 : index
    %c0_4 = arith.constant 0 : index
    %3 = vector.load %arg4[%c0_3, %c0_4] : memref<1x128xf32, #tpu.memory_space<vmem>>, vector<1x128xf32>
    %4 = vector.broadcast %3 : vector<1x128xf32> to vector<16x128xf32>
    %5 = arith.addf %2, %4 : vector<16x128xf32>
    %cst_5 = arith.constant 5.000000e-01 : f32
    %6 = vector.broadcast %cst_5 : f32 to vector<16x128xf32>
    %7 = arith.mulf %6, %5 : vector<16x128xf32>
    %cst_6 = arith.constant 0.707106769 : f32
    %8 = vector.broadcast %cst_6 : f32 to vector<16x128xf32>
    %9 = arith.mulf %5, %8 : vector<16x128xf32>
    %10 = math.erf %9 : vector<16x128xf32>
    %cst_7 = arith.constant 1.000000e+00 : f32
    %11 = vector.broadcast %cst_7 : f32 to vector<16x128xf32>
    %12 = arith.addf %11, %10 : vector<16x128xf32>
    %13 = arith.mulf %7, %12 : vector<16x128xf32>
    %c0_8 = arith.constant 0 : index
    %c0_9 = arith.constant 0 : index
    %14 = vector.load %arg5[%c0_8, %c0_9] : memref<128x32xf32, #tpu.memory_space<vmem>>, vector<128x32xf32>
    %cst_10 = arith.constant dense<0.000000e+00> : vector<16x32xf32>
    %15 = tpu.matmul %13, %14, %cst_10 {dimension_numbers = #tpu.dot_dimension_numbers<[1], [0], [0], [1], [0, 0, 1, 1], [], []>} : vector<16x128xf32>, vector<128x32xf32>, vector<16x32xf32> -> vector<16x32xf32>
    %c0_11 = arith.constant 0 : index
    %c0_12 = arith.constant 0 : index
    %16 = vector.load %arg6[%c0_11, %c0_12] : memref<1x32xf32, #tpu.memory_space<vmem>>, vector<1x32xf32>
    %17 = vector.broadcast %16 : vector<1x32xf32> to vector<16x32xf32>
    %18 = arith.addf %15, %17 : vector<16x32xf32>
    %c0_13 = arith.constant 0 : index
    %c0_14 = arith.constant 0 : index
    %19 = vector.load %arg7[%c0_13, %c0_14] : memref<16x32xf32, #tpu.memory_space<vmem>>, vector<16x32xf32>
    tpu.vector_store %arg7[%c0_13, %c0_14], %18 {strides = array<i32>} : memref<16x32xf32, #tpu.memory_space<vmem>>, vector<16x32xf32>,
    return
  }
  func.func @transform_0(%arg0: i32, %arg1: i32) -> (i32, i32) {
    %c0_i32 = arith.constant 0 : i32
    %c0_i32_0 = arith.constant 0 : i32
    return %arg0, %c0_i32 : i32, i32
  }
  func.func @transform_1(%arg0: i32, %arg1: i32) -> (i32, i32) {
    %c0_i32 = arith.constant 0 : i32
    %c0_i32_0 = arith.constant 0 : i32
    return %c0_i32, %arg1 : i32, i32
  }
  func.func @transform_2(%arg0: i32, %arg1: i32) -> (i32, i32) {
    %c0_i32 = arith.constant 0 : i32
    %c0_i32_0 = arith.constant 0 : i32
    return %c0_i32, %arg1 : i32, i32
  }
  func.func @transform_3(%arg0: i32, %arg1: i32) -> (i32, i32) {
    %c0_i32 = arith.constant 0 : i32
    %c0_i32_0 = arith.constant 0 : i32
    return %arg1, %c0_i32 : i32, i32
  }
  func.func @transform_4(%arg0: i32, %arg1: i32) -> (i32, i32) {
    %c0_i32 = arith.constant 0 : i32
    %c0_i32_0 = arith.constant 0 : i32
    %c0_i32_1 = arith.constant 0 : i32
    return %c0_i32, %c0_i32_0 : i32, i32
  }
  func.func @transform_5(%arg0: i32, %arg1: i32) -> (i32, i32) {
    %c0_i32 = arith.constant 0 : i32
    %c0_i32_0 = arith.constant 0 : i32
    return %arg0, %c0_i32 : i32, i32
  }
}

</mosaic_0001>

<bundles_post_ra>
// kernel: tpu_custom_call.1
= control target key start
LH: loop header
LB: loop body
LE: loop exit
PB: predicated region body
PF: predicated region fallthrough
CT: control target
= control target key end

     0   :  { %vm34_vm0 = vcmask 261120   ;;  %s508_s0 = inlined_call_operand.vmem [shape: f32[16,32], index: 0, kind: input, shape index: {}]   ;;  %s509_s1 = inlined_call_operand.vmem [shape: f32[32,128], index: 1, kind: input, shape index: {}]   ;;  %s510_s2 = inlined_call_operand.vmem [shape: f32[1,128], index: 2, kind: input, shape index: {}]   ;;  %s511_s3 = inlined_call_operand.vmem [shape: f32[128,32], index: 3, kind: input, shape index: {}]   ;;  %s512_s4 = inlined_call_operand.vmem [shape: f32[1,32], index: 4, kind: input, shape index: {}]   ;;  %s513_s5 = inlined_call_operand.hbm [shape: f32[16,32], index: 5, kind: output, shape index: {}]  }
   0x1   :  { %v23_v0 = vld [vmem:[%s509_s1] sm:$0xff]  ;;  %v24_v1 = vld [vmem:[%s509_s1 + $0x8] sm:$0xff]  ;;  %v25_v2 = vld [vmem:[%s509_s1 + $0x10] sm:$0xff] }
   0x2   :  { %v316_v3 = vpack.c.bf16 %v24_v1, %v23_v0  ;;  %v26_v4 = vld [vmem:[%s509_s1 + $0x18] sm:$0xff]  ;;  %v21_v5 = vld [vmem:[%s508_s0] sm:$0xff]  ;;  %v127_v8 = vld [vmem:[%s511_s3 + $0x8] sm:$0xff] }
   0x3   :  { %v320_v6 = vpack.c.bf16 %v26_v4, %v25_v2  ;;  %278 = vmatprep.mubr.msk.f32.mxu0 %vm34_vm0, %v21_v5  ;;  %v126_v7 = vld [vmem:[%s511_s3] sm:$0xff]  ;;  %v128_v9 = vld [vmem:[%s511_s3 + $0x10] sm:$0xff]  ;;  %v129_v11 = vld [vmem:[%s511_s3 + $0x18] sm:$0xff] }
   0x4   :  { %317 = vmatprep.subr.bf16.mxu0 %v316_v3  ;;  %v324_v10 = vpack.c.bf16 %v127_v8, %v126_v7  ;;  %v328_v12 = vpack.c.bf16 %v129_v11, %v128_v9  ;;  %v130_v13 = vld [vmem:[%s511_s3 + $0x20] sm:$0xff]  ;;  %v131_v14 = vld [vmem:[%s511_s3 + $0x28] sm:$0xff] }
   0x5   :  { %319 = vmatpush3.bf16.msra.mxu0 %v316_v3 }
   0x6   :  { %10 = vsyncpa [#allocation3], 0  ;;  %321 = vmatprep.subr.bf16.mxu0 %v320_v6  ;;  %325 = vmatprep.subr.bf16.mxu1 %v324_v10  ;;  %v332_v15 = vpack.c.bf16 %v131_v14, %v130_v13  ;;  %v22_v16 = vld [vmem:[%s508_s0 + $0x8] sm:$0xff]  ;;  %v132_v17 = vld [vmem:[%s511_s3 + $0x30] sm:$0xff]  ;;  %s387_s11 = smov [#allocation2]  }
   0x7   :  { %327 = vmatpush3.bf16.msra.mxu1 %v324_v10  ;;  %v133_v18 = vld [vmem:[%s511_s3 + $0x38] sm:$0xff]  ;;  %v134_v20 = vld [vmem:[%s511_s3 + $0x40] sm:$0xff]  ;;  %v135_v21 = vld [vmem:[%s511_s3 + $0x48] sm:$0xff]  ;;  %s231_s12 = sshll.u32 %s387_s11, 4  ;;  %s232_s12 = int_to_ptr.vmem [resolvable:$true] %s231_s12 }
   0x8   :  { %329 = vmatprep.subr.bf16.mxu1 %v328_v12  ;;  %v336_v19 = vpack.c.bf16 %v133_v18, %v132_v17  ;;  %v340_v22 = vpack.c.bf16 %v135_v21, %v134_v20  ;;  %v136_v23 = vld [vmem:[%s511_s3 + $0x50] sm:$0xff]  ;;  %v137_v24 = vld [vmem:[%s511_s3 + $0x58] sm:$0xff]  ;;  %v138_v26 = vld [vmem:[%s511_s3 + $0x60] sm:$0xff]  ;;  %s363_s13 = scalar_lea.vmem %s232_s12, 256  ;;  %p368_p1 = scmp.lt.s32.totalorder %s232_s12, %s232_s12 }
   0x9   :  { %323 = vmatpush3.bf16.msra.mxu0 %v320_v6  ;;  %v344_v25 = vpack.c.bf16 %v137_v24, %v136_v23  ;;  %v139_v27 = vld [vmem:[%s511_s3 + $0x68] sm:$0xff]  ;;  %v140_v29 = vld [vmem:[%s511_s3 + $0x70] sm:$0xff]  ;;  %v141_v30 = vld [vmem:[%s511_s3 + $0x78] sm:$0xff]  ;;  %p364_p0 = scmp.ne.s32.totalorder %s232_s12, %s363_s13  ;;  %p369_p2 = scmp.lt.s32.totalorder %s363_s13, %s363_s13 }
   0xa   :  { %v348_v28 = vpack.c.bf16 %v139_v27, %v138_v26  ;;  %v352_v31 = vpack.c.bf16 %v141_v30, %v140_v29  ;;  %v242_v32 = vld [vmem:[%s510_s2] ss:$0 sm:$0xff] }
   0xb   :  { %331 = vmatpush3.bf16.msra.mxu1 %v328_v12  ;;  %v245_v47 = vld [vmem:[%s512_s4] ss:$0 sm:$0xff]  ;;  %p370_p3 = por %p369_p2, %p368_p1 }
   0xc   :  { %279 = vmatmul.mubr.msk.f32.vlgmr.msra.gmra.mrb[0].mxu0 %vm34_vm0, %v22_v16  ;;  %333 = vmatprep.subr.bf16.mxu1 %v332_v15 }
   0xd   :  { %p371_p4 = pnand %p370_p3, %p364_p0 }
   0xf   :  { %335 = vmatpush3.bf16.msra.mxu1 %v332_v15 }
  0x10   :  { %337 = vmatprep.subr.bf16.mxu1 %v336_v19 }
  0x13   :  { %339 = vmatpush3.bf16.msra.mxu1 %v336_v19 }
  0x14   :  { %341 = vmatprep.subr.bf16.mxu1 %v340_v22 }
  0x17   :  { %343 = vmatpush3.bf16.msra.mxu1 %v340_v22 }
  0x18   :  { %345 = vmatprep.subr.bf16.mxu1 %v344_v25 }
  0x1b   :  { %347 = vmatpush3.bf16.msra.mxu1 %v344_v25 }
  0x1c   :  { %349 = vmatprep.subr.bf16.mxu1 %v348_v28 }
  0x1f   :  { %351 = vmatpush3.bf16.msra.mxu1 %v348_v28 }
  0x20   :  { %353 = vmatprep.subr.bf16.mxu1 %v352_v31 }
  0x23   :  { %355 = vmatpush3.bf16.msra.mxu1 %v352_v31 }
  0xdf   :  { %v280_v33 = vpop.f32.mrb[0].mxu0 }
  0xe0   :  { %v113_v34 = vadd.f32 %v280_v33, %v242_v32  ;;  %v107_v35 = vpop.f32.mrb[1].mxu0 }
  0xe1   :  { %v108_v36 = vadd.f32 %v242_v32, %v107_v35 }
  0xe2   :  { %v119_v37 = vmul.f32 0.70710677, %v113_v34  ;;  %v117_v44 = vmul.f32 0.5, %v113_v34 }
  0xe3   :  { %v118_v38 = vmul.f32 0.70710677, %v108_v36  ;;  %v116_v42 = vmul.f32 0.5, %v108_v36 }
  0xe4   :  { %359 = verf.f32 %v119_v37 }
  0xe5   :  { %361 = verf.f32 %v118_v38 }
  0xee   :  { %v360_v39 = vpop.eup %359 }
  0xef   :  { %v362_v40 = vpop.eup %361  ;;  %v123_v41 = vadd.f32 1.0, %v360_v39 }
  0xf0   :  { %v122_v43 = vadd.f32 1.0, %v362_v40 }
  0xf1   :  { %v125_v46 = vmul.f32 %v123_v41, %v117_v44 }
  0xf2   :  { %v124_v45 = vmul.f32 %v122_v43, %v116_v42 }
  0xf4   :  { %313 = vmatprep.mubr.f32.mxu1 %v124_v45 }
  0xf5   :  { %314 = vmatmul.mubr.f32.vlgmr.msra.gmra.mrb[0].mxu1 %v125_v46 }
 0x1c8   :  { %v315_v48 = vpop.f32.mrb[0].mxu1 }
 0x1c9   :  { %v221_v49 = vadd.f32 %v315_v48, %v245_v47  ;;  %v215_v50 = vpop.f32.mrb[1].mxu1 }
 0x1ca   :  { %v216_v51 = vadd.f32 %v245_v47, %v215_v50 }
 0x1cb   :  { %225 = vst.msk [vmem:[#allocation2 + $0x8] sm:$0xff] %vm34_vm0, %v221_v49 }
 0x1cc   :  { %224 = vst.msk [vmem:[#allocation2] sm:$0xff] %vm34_vm0, %v216_v51 }
 0x1cd   :  { %374 = shalt.err (!%p371_p4)
}
 0x1ce   :  { %s375_s15 = scalar_lea.hbm %s513_s5, 256 }
 0x1cf   :  { %p376_p5 = scmp.ne.s32.totalorder %s513_s5, %s375_s15  ;;  %p379_p6 = scmp.lt.u32.totalorder %s375_s15, %s513_s5 }
 0x1d1   :  { %p381_p7 = pnand %p379_p6, %p376_p5 }
 0x1d3   :  { %384 = shalt.err (!%p381_p7)
}
 0x1d4   :  { %s388_s20 = smov 128   ;;  %s389_s21 = smov 8  }
 0x1d5   :  { %237 = dma.vmem_to_hbm [thread:$0]  %s232_s12, 256, %s513_s5, [#allocation3], %s388_s20, %s388_s20, %s389_s21  }
 0x1d6   :  { %385 = dma.done.wait [#allocation3], 256  }
 0x1d7   :  { %386 = vsyncadd [#allocation3], 4294967040 }
 0x1d8   :  { %241 = vsyncpa [#allocation3], 1 }

</bundles_post_ra>
